<compile_context>
chip_gen: v5e
topology: v5e:2x2
jax: 0.10.0
libtpu: 0.0.40
codegen_flags: <defaults>
</compile_context>

<pallas_src>
import math
from functools import partial

import numpy as np

import jax
import jax.numpy as jnp
from jax.experimental import pallas as pl
from jax.experimental.pallas import tpu as pltpu

_GRAY_W = {'b': 0.114, 'g': 0.587, 'r': 0.299}
_TARGET_STEP_BYTES = 2 << 20     # ~2 MiB of source pixels per grid step
_VMEM_BUDGET_BYTES = 12 << 20    # double-buffered working set (v5e scoped default is 16 MiB)


def _make_gray_crop_kernel(n_frames_blk, top, crop_h):
    """Kernel over one block of `n_frames_blk` frames.

    x_ref : (F, H, 3*W)  channel-interleaved pixel rows, native dtype
    k_ref : (3*W, tw)    banded crop+gray basis, f32
    o_ref : (F, th, tw)  cropped grayscale frames
    """
    def kernel(x_ref, k_ref, o_ref):
        k = k_ref[...]
        for f in range(n_frames_blk):                                   # small static unroll
            rows = x_ref[f, top:top + crop_h, :].astype(jnp.float32)    # (th, 3W) H-crop + cast
            g = jnp.dot(rows, k, preferred_element_type=jnp.float32)    # W-crop + gray on the MXU
            o_ref[f, :, :] = g.astype(o_ref.dtype)
    return kernel


def _frames_per_step(n_frames, frame_in_bytes, frame_out_bytes):
    f = max(1, _TARGET_STEP_BYTES // max(frame_in_bytes, 1))
    per_frame_vmem = 2 * frame_in_bytes + 2 * frame_out_bytes           # double-buffered in + out
    f = min(f, max(1, _VMEM_BUDGET_BYTES // max(per_frame_vmem, 1)))
    f = min(f, n_frames)
    if n_frames >= 2:            # keep >= 2 grid steps so v7x can shard across both TensorCores
        f = min(f, -(-n_frames // 2))
    return int(max(f, 1))


@partial(jax.jit, static_argnames=('channel_input', 'size'))
def _gray_crop_pallas(x, *, channel_input, size):
    """x: (..., H, W, 3) -> CenterCrop(size)(gray(x)), shape (..., th, tw)."""
    *lead, H, W, C = x.shape
    assert C == 3, x.shape
    n_frames = int(math.prod(lead)) if lead else 1

    if size is None:
        th, tw, top, left = H, W, 0, 0
    else:
        th, tw = size
        assert th <= H and tw <= W, 'CenterCrop pad-if-smaller path not implemented'
        top = int(round((H - th) / 2.0))
        left = int(round((W - tw) / 2.0))

    ch2idx = {channel_input[i]: i for i in range(len(channel_input))}
    coef = [0.0, 0.0, 0.0]
    for ch, w in _GRAY_W.items():
        coef[ch2idx[ch]] = w

    # Banded crop+gray basis: column j picks the 3 interleaved channels of
    # pixel (left + j) and mixes them with the grayscale weights, so a single
    # matmul per frame row does the W-crop and the grayscale together.
    kmat = np.zeros((3 * W, tw), np.float32)
    j = np.arange(tw)
    for c in range(3):
        kmat[3 * (left + j) + c, j] = coef[c]
    kmat = jnp.asarray(kmat)

    out_dtype = x.dtype if jnp.issubdtype(x.dtype, jnp.floating) else jnp.float32

    # Free, contiguous reshapes only: (..., H, W, 3) -> (N, H, 3W).
    x3 = x.reshape(n_frames, H, 3 * W)

    frame_in_bytes = H * 3 * W * x.dtype.itemsize
    frame_out_bytes = th * tw * jnp.dtype(out_dtype).itemsize
    nf_blk = _frames_per_step(n_frames, frame_in_bytes, frame_out_bytes)

    out = pl.pallas_call(
        _make_gray_crop_kernel(nf_blk, top, th),
        out_shape=jax.ShapeDtypeStruct((n_frames, th, tw), out_dtype),
        grid=(pl.cdiv(n_frames, nf_blk),),         # ragged last block handled by Pallas
        in_specs=[
            pl.BlockSpec((nf_blk, H, 3 * W), lambda i: (i, 0, 0)),
            pl.BlockSpec((3 * W, tw), lambda i: (0, 0)),   # constant index -> stays resident
        ],
        out_specs=pl.BlockSpec((nf_blk, th, tw), lambda i: (i, 0, 0)),
        compiler_params=pltpu.CompilerParams(
            dimension_semantics=("parallel",)),
    )(x3, kmat)

    return out.reshape(*lead, th, tw)


def _center_crop(x, size, spatial_axes=(-2, -1)):
    """torchvision CenterCrop on the given two axes (no pad_if_needed path)."""
    th, tw = size
    ah, aw = spatial_axes
    H, W = x.shape[ah], x.shape[aw]
    assert th <= H and tw <= W, 'CenterCrop pad-if-smaller path not implemented'
    top = int(round((H - th) / 2.0))
    left = int(round((W - tw) / 2.0))
    idx = [slice(None)] * x.ndim
    idx[ah] = slice(top, top + th)
    idx[aw] = slice(left, left + tw)
    return x[tuple(idx)]


def gray_crop_flip(x, length=None, *, channel_input='bgr', size=None,
                   random=False, skip_gray=False, training=False):
    """JAX/Pallas forward of GrayCropFlip (deterministic eval-transform path)."""
    if size is not None:
        size = (int(size), int(size)) if isinstance(size, int) else tuple(int(s) for s in size)
    if size is not None and training and random:
        # TODO(synk): train-time RandomCrop + RandomHorizontalFlip (stochastic torch RNG)
        # not reproduced; using the deterministic CenterCrop (eval_transform) path.
        pass
    if skip_gray:
        out = _center_crop(x, size) if size is not None else x
        return out, length
    if sorted(channel_input) != ['b', 'g', 'r']:
        raise ValueError(
            "channel_input must be a length-3 permutation of 'bgr', got {!r}".format(channel_input))
    assert x.shape[-1] == 3, (
        'shape error: input must have r,g,b 3 channels, but got {}'.format(x.shape))
    out = _gray_crop_pallas(x, channel_input=channel_input, size=size)
    return out, length


def _reference(x, *, channel_input='bgr', size=None, skip_gray=False):
    """Pure-JAX f32 reference mirroring the torch forward (gray, then CenterCrop)."""
    if not skip_gray:
        ch2idx = {channel_input[i]: i for i in range(len(channel_input))}
        x = (0.114 * x[..., ch2idx['b']].astype(jnp.float32)
             + 0.587 * x[..., ch2idx['g']].astype(jnp.float32)
             + 0.299 * x[..., ch2idx['r']].astype(jnp.float32))
    if size is not None:
        size = (size, size) if isinstance(size, int) else tuple(size)
        x = _center_crop(x, size)
    return x


if __name__ == "__main__":
    key = jax.random.PRNGKey(0)
    B, T, H, W = 2, 4, 16, 16            # small video-frame-like batch
    size = (8, 8)                         # CenterCrop target

    x = jax.random.uniform(key, (B, T, H, W, 3), dtype=jnp.float32)
    length = jnp.full((B,), T, dtype=jnp.int32)

    # CenterCrop + gray (8 frames -> grid of 2 x 4-frame blocks, misaligned H-crop).
    out, out_len = gray_crop_flip(x, length, channel_input='bgr', size=size)
    out = jax.block_until_ready(out)
    ref = _reference(x, channel_input='bgr', size=size)
    assert out.shape == ref.shape == (B, T, 8, 8), (out.shape, ref.shape)
    max_err = float(jnp.max(jnp.abs(out - ref)))
    assert max_err < 2e-2, max_err       # DEFAULT-precision (single-pass bf16) matmul
    assert out_len is length

    # No-crop gray path with a frame count that leaves a ragged last grid block.
    x2 = jax.random.uniform(jax.random.PRNGKey(1), (3, H, W, 3), dtype=jnp.float32)
    out2, _ = gray_crop_flip(x2, None, channel_input='bgr', size=None)
    out2 = jax.block_until_ready(out2)
    ref2 = _reference(x2, channel_input='bgr', size=None)
    assert out2.shape == ref2.shape == (3, H, W), (out2.shape, ref2.shape)
    assert float(jnp.max(jnp.abs(out2 - ref2))) < 2e-2

    print("KERNEL_OK")
</pallas_src>

<mosaic_0001>
module attributes {stable_mosaic.version = 11 : i64} {
  func.func @kernel(%arg0: i32, %arg1: memref<4x16x48xf32, #tpu.memory_space<vmem>>, %arg2: memref<48x8xf32, #tpu.memory_space<vmem>>, %arg3: memref<4x8x8xf32, #tpu.memory_space<vmem>>) attributes {dimension_semantics = [#tpu.dimension_semantics<parallel>], iteration_bounds = array<i64: 2>, scalar_prefetch = 0 : i64, scratch_operands = 0 : i64, tpu.core_type = #tpu.core_type<tc>, window_params = [{transform_indices = @transform_0, window_bounds = array<i64: 4, 16, 48>}, {pipeline_mode = #tpu.pipeline_mode<synchronous>, transform_indices = @transform_1, window_bounds = array<i64: 48, 8>}, {transform_indices = @transform_2, window_bounds = array<i64: 4, 8, 8>}]} {
    %c0 = arith.constant 0 : index
    %c0_0 = arith.constant 0 : index
    %0 = vector.load %arg2[%c0, %c0_0] : memref<48x8xf32, #tpu.memory_space<vmem>>, vector<48x8xf32>
    %c0_1 = arith.constant 0 : index
    %c4 = arith.constant 4 : index
    %c0_2 = arith.constant 0 : index
    %1 = vector.load %arg1[%c0_1, %c4, %c0_2] : memref<4x16x48xf32, #tpu.memory_space<vmem>>, vector<1x8x48xf32>
    %2 = vector.shape_cast %1 : vector<1x8x48xf32> to vector<8x48xf32>
    %cst = arith.constant dense<0.000000e+00> : vector<8x8xf32>
    %3 = tpu.matmul %2, %0, %cst {dimension_numbers = #tpu.dot_dimension_numbers<[1], [0], [0], [1], [0, 0, 1, 1], [], []>} : vector<8x48xf32>, vector<48x8xf32>, vector<8x8xf32> -> vector<8x8xf32>
    %c0_3 = arith.constant 0 : index
    %c0_4 = arith.constant 0 : index
    %c0_5 = arith.constant 0 : index
    %4 = vector.load %arg3[%c0_3, %c0_4, %c0_5] : memref<4x8x8xf32, #tpu.memory_space<vmem>>, vector<1x8x8xf32>
    %5 = vector.shape_cast %4 : vector<1x8x8xf32> to vector<8x8xf32>
    %6 = vector.shape_cast %3 : vector<8x8xf32> to vector<1x8x8xf32>
    tpu.vector_store %arg3[%c0_3, %c0_4, %c0_5], %6 {strides = array<i32>} : memref<4x8x8xf32, #tpu.memory_space<vmem>>, vector<1x8x8xf32>,
    %c1 = arith.constant 1 : index
    %c4_6 = arith.constant 4 : index
    %c0_7 = arith.constant 0 : index
    %7 = vector.load %arg1[%c1, %c4_6, %c0_7] : memref<4x16x48xf32, #tpu.memory_space<vmem>>, vector<1x8x48xf32>
    %8 = vector.shape_cast %7 : vector<1x8x48xf32> to vector<8x48xf32>
    %cst_8 = arith.constant dense<0.000000e+00> : vector<8x8xf32>
    %9 = tpu.matmul %8, %0, %cst_8 {dimension_numbers = #tpu.dot_dimension_numbers<[1], [0], [0], [1], [0, 0, 1, 1], [], []>} : vector<8x48xf32>, vector<48x8xf32>, vector<8x8xf32> -> vector<8x8xf32>
    %c1_9 = arith.constant 1 : index
    %c0_10 = arith.constant 0 : index
    %c0_11 = arith.constant 0 : index
    %10 = vector.load %arg3[%c1_9, %c0_10, %c0_11] : memref<4x8x8xf32, #tpu.memory_space<vmem>>, vector<1x8x8xf32>
    %11 = vector.shape_cast %10 : vector<1x8x8xf32> to vector<8x8xf32>
    %12 = vector.shape_cast %9 : vector<8x8xf32> to vector<1x8x8xf32>
    tpu.vector_store %arg3[%c1_9, %c0_10, %c0_11], %12 {strides = array<i32>} : memref<4x8x8xf32, #tpu.memory_space<vmem>>, vector<1x8x8xf32>,
    %c2 = arith.constant 2 : index
    %c4_12 = arith.constant 4 : index
    %c0_13 = arith.constant 0 : index
    %13 = vector.load %arg1[%c2, %c4_12, %c0_13] : memref<4x16x48xf32, #tpu.memory_space<vmem>>, vector<1x8x48xf32>
    %14 = vector.shape_cast %13 : vector<1x8x48xf32> to vector<8x48xf32>
    %cst_14 = arith.constant dense<0.000000e+00> : vector<8x8xf32>
    %15 = tpu.matmul %14, %0, %cst_14 {dimension_numbers = #tpu.dot_dimension_numbers<[1], [0], [0], [1], [0, 0, 1, 1], [], []>} : vector<8x48xf32>, vector<48x8xf32>, vector<8x8xf32> -> vector<8x8xf32>
    %c2_15 = arith.constant 2 : index
    %c0_16 = arith.constant 0 : index
    %c0_17 = arith.constant 0 : index
    %16 = vector.load %arg3[%c2_15, %c0_16, %c0_17] : memref<4x8x8xf32, #tpu.memory_space<vmem>>, vector<1x8x8xf32>
    %17 = vector.shape_cast %16 : vector<1x8x8xf32> to vector<8x8xf32>
    %18 = vector.shape_cast %15 : vector<8x8xf32> to vector<1x8x8xf32>
    tpu.vector_store %arg3[%c2_15, %c0_16, %c0_17], %18 {strides = array<i32>} : memref<4x8x8xf32, #tpu.memory_space<vmem>>, vector<1x8x8xf32>,
    %c3 = arith.constant 3 : index
    %c4_18 = arith.constant 4 : index
    %c0_19 = arith.constant 0 : index
    %19 = vector.load %arg1[%c3, %c4_18, %c0_19] : memref<4x16x48xf32, #tpu.memory_space<vmem>>, vector<1x8x48xf32>
    %20 = vector.shape_cast %19 : vector<1x8x48xf32> to vector<8x48xf32>
    %cst_20 = arith.constant dense<0.000000e+00> : vector<8x8xf32>
    %21 = tpu.matmul %20, %0, %cst_20 {dimension_numbers = #tpu.dot_dimension_numbers<[1], [0], [0], [1], [0, 0, 1, 1], [], []>} : vector<8x48xf32>, vector<48x8xf32>, vector<8x8xf32> -> vector<8x8xf32>
    %c3_21 = arith.constant 3 : index
    %c0_22 = arith.constant 0 : index
    %c0_23 = arith.constant 0 : index
    %22 = vector.load %arg3[%c3_21, %c0_22, %c0_23] : memref<4x8x8xf32, #tpu.memory_space<vmem>>, vector<1x8x8xf32>
    %23 = vector.shape_cast %22 : vector<1x8x8xf32> to vector<8x8xf32>
    %24 = vector.shape_cast %21 : vector<8x8xf32> to vector<1x8x8xf32>
    tpu.vector_store %arg3[%c3_21, %c0_22, %c0_23], %24 {strides = array<i32>} : memref<4x8x8xf32, #tpu.memory_space<vmem>>, vector<1x8x8xf32>,
    return
  }
  func.func @transform_0(%arg0: i32) -> (i32, i32, i32) {
    %c0_i32 = arith.constant 0 : i32
    %c0_i32_0 = arith.constant 0 : i32
    %c0_i32_1 = arith.constant 0 : i32
    return %arg0, %c0_i32, %c0_i32_0 : i32, i32, i32
  }
  func.func @transform_1(%arg0: i32) -> (i32, i32) {
    %c0_i32 = arith.constant 0 : i32
    %c0_i32_0 = arith.constant 0 : i32
    %c0_i32_1 = arith.constant 0 : i32
    return %c0_i32, %c0_i32_0 : i32, i32
  }
  func.func @transform_2(%arg0: i32) -> (i32, i32, i32) {
    %c0_i32 = arith.constant 0 : i32
    %c0_i32_0 = arith.constant 0 : i32
    %c0_i32_1 = arith.constant 0 : i32
    return %arg0, %c0_i32, %c0_i32_0 : i32, i32, i32
  }
}

</mosaic_0001>

<bundles_post_ra>
// kernel: _gray_crop_pallas.1
= control target key start
LH: loop header
LB: loop body
LE: loop exit
PB: predicated region body
PF: predicated region fallthrough
CT: control target
= control target key end

     0   :  { %7 = vsyncpa [#allocation3], 0  ;;  %s589_s0 = inlined_call_operand.vmem [shape: f32[8,16,48], index: 0, kind: input, shape index: {}]   ;;  %s590_s1 = inlined_call_operand.vmem [shape: f32[48,8], index: 1, kind: input, shape index: {}]   ;;  %s591_s2 = inlined_call_operand.hbm [shape: f32[8,8,8], index: 2, kind: output, shape index: {}]  }
   0x1   :  { %9 = vsyncpa [#allocation3 + $0x1], 0  ;;  %s487_s9 = smov 0   ;;  %s489_s10 = smov 0  }
   0x2   :  { %s491_s11 = smov 0   ;;  %s493_s12 = smov 0  }
   0x3 LB: > { %s508_s13 = sadd.s32 4294967295, %s468_s12   ;;  %s340_s14 = sadd.s32 4294967294, %s468_s12   ;;  %s468_s12 = sphi %s493_s12, %s597_s12   ;;  %s464_s11 = sphi %s491_s11, %s596_s11   ;;  %s460_s10 = sphi %s489_s10, %s595_s10   ;;  %s456_s9 = sphi %s487_s9, %s594_s9  }
   0x4   : > { %s512_s15 = sadd.s32 1, %s468_s12   ;;  %s69_s16 = sadd.s32 1, %s464_s11 }
   0x5   : > { %s66_s17 = ssub.s32 %s468_s12, %s512_s15  ;;  %p79_p0 = scmp.ne.s32.totalorder %s464_s11, %s460_s10 }
   0x6   : > { %p67_p1 = scmp.eq.s32.totalorder %s66_s17, 0  ;;  %p80_p2 = scmp.eq.s32.totalorder %s508_s13, 1 }
   0x7   : > { %p85_p3 = scmp.ne.s32.totalorder %s460_s10, %s456_s9  ;;  %p86_p4 = scmp.eq.s32.totalorder %s340_s14, 1 }
   0x8   : > { %s523_s18 = scalar_select %p67_p1, %s464_s11, %s69_s16  }
   0x9   : > { %p525_p5 = por %p80_p2, %p79_p0  ;;  %p529_p6 = por %p86_p4, %p85_p3 }
   0xa   : > { %p343_p7 = scmp.ge.s32.totalorder %s468_s12, 1  ;;  %p117_p8 = scmp.lt.s32.totalorder %s468_s12, 3 }
   0xc   : > { %p118_p9 = pnand %p343_p7, %p117_p8 }
   0xd   : > { %s345_s25 = sshll.u32 (!%p118_p9), %s508_s13, 2  ;;  %s137_s16 = sand.u32 (!%p118_p9), 1, %s460_s10  }
   0xe   : > { %121 = sbr.rel (%p118_p9) target bundleno = 168 (0xa8), region = 28  ;;  %p141_p10 = scmp.lt.s32.totalorder (!%p118_p9), %s345_s25, 7 }
   0xf   : > { %s344_s17 = sshll.u32 (!%p118_p9), %s137_s16, 5  ;;  %s364_s21 = sshll.u32 (!%p118_p9), %s508_s13, 5 }
  0x10   : > { %s274_s24 = scalar_lea.hbm (!%p118_p9), %s591_s2, %s364_s21  ;;  %s263_s13 = scalar_lea.sflag (!%p118_p9), [#allocation3], %s137_s16 }
  0x11   : > { %s277_s27 = sshll.u32 (!%p118_p9), %s274_s24, 4  ;;  %s426_s4 = scalar_lea.hbm (!%p118_p9), %s591_s2, 64  ;;  %s278_s27 = int_to_ptr.hbm [resolvable:$true] %s277_s27 }
  0x12   : > { %s420_s28 = sshra.s32 (!%p118_p9), %s278_s27, 4  ;;  %s421_s28 = int_to_ptr.hbm [resolvable:$true] %s420_s28 }
  0x13   : > { %v153_v0 = vld [vmem:[%s590_s1 + $0x28] sm:$0xff]  ;;  %v152_v1 = vld [vmem:[%s590_s1 + $0x20] sm:$0xff]  ;;  %v151_v2 = vld [vmem:[%s590_s1 + $0x18] sm:$0xff]  ;;  %s599_s25 = smov (!%p141_p10, %s345_s25), 7  ;;  %vm155_vm0 = vcmask 392192   ;;  %vm179_vm1 = vcmask 64512   ;;  %p427_p0 = scmp.lt.s32.totalorder %s421_s28, %s591_s2 }
  0x14   : > { %223 = vmatpush.msra.mxu2 %v153_v0  ;;  %250 = vmatpush.msra.mxu3 %v153_v0  ;;  %v150_v3 = vld [vmem:[%s590_s1 + $0x10] sm:$0xff]  ;;  %s363_s30 = sshll.u32 %s599_s25, 4  ;;  %v149_v4 = vld [vmem:[%s590_s1 + $0x8] sm:$0xff]  ;;  %v148_v5 = vld [vmem:[%s590_s1] sm:$0xff]  ;;  %s139_s25 = scalar_lea.vmem [#allocation2], %s344_s17 }
  0x15   : > { %169 = vmatpush.msra.mxu0 %v153_v0  ;;  %196 = vmatpush.msra.mxu1 %v153_v0  ;;  %s145_s7 = scalar_lea.vmem %s589_s0, %s363_s30  ;;  %s275_s26 = sshll.u32 %s139_s25, 4  ;;  %s276_s26 = int_to_ptr.vmem [resolvable:$true] %s275_s26 }
  0x16   : > { %224 = vmatpush.msra.mxu2 %v152_v1  ;;  %251 = vmatpush.msra.mxu3 %v152_v1  ;;  %v352_v6 = vld [vmem:[%s145_s7 + $0x24] sm:$0xff]  ;;  %v355_v7 = vld [vmem:[%s145_s7 + $0x34] sm:$0xff]  ;;  %s422_s29 = scalar_lea.hbm %s421_s28, 32 }
  0x17   : > { %170 = vmatpush.msra.mxu0 %v152_v1  ;;  %197 = vmatpush.msra.mxu1 %v152_v1  ;;  %v154_v8 = vld [vmem:[%s145_s7 + $0x4] sm:$0xff]  ;;  %v349_v9 = vld [vmem:[%s145_s7 + $0x14] sm:$0xff]  ;;  %p423_p11 = scmp.ne.s32.totalorder %s421_s28, %s422_s29  ;;  %p428_p1 = scmp.lt.s32.totalorder %s426_s4, %s422_s29 }
  0x18   : > { %225 = vmatpush.msra.mxu2 %v151_v2  ;;  %252 = vmatpush.msra.mxu3 %v151_v2 }
  0x19   : > { %171 = vmatpush.msra.mxu0 %v151_v2  ;;  %198 = vmatpush.msra.mxu1 %v151_v2  ;;  %p424_p12 = pnand %p423_p11, %p525_p5  ;;  %p429_p2 = por %p428_p1, %p427_p0 }
  0x1a   : > { %226 = vmatpush.msra.mxu2 %v150_v3  ;;  %253 = vmatpush.msra.mxu3 %v150_v3 }
  0x1b   : > { %172 = vmatpush.msra.mxu0 %v150_v3  ;;  %199 = vmatpush.msra.mxu1 %v150_v3  ;;  %p425_p13 = pneg %p424_p12 }
  0x1c   : > { %227 = vmatpush.msra.mxu2 %v149_v4  ;;  %254 = vmatpush.msra.mxu3 %v149_v4 }
  0x1d   : > { %173 = vmatpush.msra.mxu0 %v149_v4  ;;  %200 = vmatpush.msra.mxu1 %v149_v4  ;;  %p430_p3 = pnand %p429_p2, %p425_p13 }
  0x1e   : > { %228 = vmatpush.msra.mxu2 %v148_v5  ;;  %255 = vmatpush.msra.mxu3 %v148_v5 }
  0x1f   : > { %353 = vmatmul.msk.f32.vlgmr.msra.gmra.mxu2 %vm155_vm0, %v352_v6  ;;  %356 = vmatmul.msk.f32.vlgmr.msra.gmra.mxu3 %vm155_vm0, %v355_v7 }
  0x20   : > { %174 = vmatpush.msra.mxu0 %v148_v5  ;;  %201 = vmatpush.msra.mxu1 %v148_v5 }
  0x21   : > { %348 = vmatmul.msk.f32.vlgmr.msra.gmra.mxu0 %vm155_vm0, %v154_v8  ;;  %350 = vmatmul.msk.f32.vlgmr.msra.gmra.mxu1 %vm155_vm0, %v349_v9 }
  0x9e   : > { %v176_v10 = vpop.f32.mrf.mxu0  ;;  %v203_v11 = vpop.f32.mrf.mxu1 }
  0x9f   : > { %180 = vst.msk [vmem:[%s139_s25] sm:$0xff] %vm179_vm1, %v176_v10 }
  0xa0   : > { %351 = vst.msk [vmem:[%s139_s25 + $0x8] sm:$0xff] %vm179_vm1, %v203_v11 }
  0xa2   : > { %v230_v12 = vpop.f32.mrf.mxu2  ;;  %v257_v13 = vpop.f32.mrf.mxu3 }
  0xa3   : > { %354 = vst.msk [vmem:[%s139_s25 + $0x10] sm:$0xff] %vm179_vm1, %v230_v12 }
  0xa4   : > { %357 = vst.msk [vmem:[%s139_s25 + $0x18] sm:$0xff] %vm179_vm1, %v257_v13 }
  0xa5   : > { %433 = shalt.err (!%p430_p3)
}
  0xa6   : > { %s470_s7 = smov 128   ;;  %s471_s8 = smov 8  }
  0xa7   : > { %365 = dma.vmem_to_hbm [thread:$0]  (%p525_p5), %s276_s26, 512, %s278_s27, %s263_s13, %s470_s7, %s470_s7, %s471_s8  }
  0xa8 PF: > { %p371_p4 = scmp.ge.s32.totalorder %s468_s12, 2  ;;  %s292_s14 = sand.u32 1, %s456_s9  }
  0xa9   : > { %s293_s16 = scalar_lea.sflag [#allocation3], %s292_s14 }
  0xaa   : > { %p368_p7 = pnand %p371_p4, %p529_p6 }
  0xac   : > { %p369_p8 = pneg %p368_p7 }
  0xae   : > { %451 = dma.done.wait (%p369_p8), %s293_s16, 512  }
  0xaf   : > { %453 = vsyncadd (%p369_p8), %s293_s16, 4294966784  ;;  %p12_p9 = scmp.ge.s32.totalorder %s512_s15, 4   ;;  %s594_s9 = smov %s460_s10 }
  0xb0   : > { %s595_s10 = smov %s464_s11  ;;  %s596_s11 = smov %s523_s18 }
  0xb1   : > { %s597_s12 = smov %s512_s15  ;;  %14 = sbr.rel (!%p12_p9) target bundleno = 3 (0x3), region = 69 }
  0xb6   :  { %299 = vsyncpa [#allocation3], 1 }
  0xb7   :  { %301 = vsyncpa [#allocation3 + $0x1], 1 }

</bundles_post_ra>
